<compile_context>
chip_gen: v7x
topology: tpu7x:2x2x1
jax: 0.10.0
libtpu: 0.0.40
codegen_flags: <defaults>
</compile_context>

<pallas_src>
import jax
import jax.numpy as jnp
from jax.experimental import pallas as pl
from jax.experimental.pallas import tpu as pltpu


_VMEM_LIMIT_BYTES = 32 * 1024 * 1024  # explicit, safe on v5e / v6e / v7x


def _compiler_params():
    return pltpu.CompilerParams(dimension_semantics=("parallel",),
                                vmem_limit_bytes=_VMEM_LIMIT_BYTES)


# ---------------------------------------------------------------------------
# Bidirectional single-layer GRU with packed-sequence semantics (length masking)
# ---------------------------------------------------------------------------
def _bigru_kernel(x_ref, lens_ref,
                  w1f_ref, w2f_ref, b1f_ref, b2f_ref,
                  w1b_ref, w2b_ref, b1b_ref, b2b_ref,
                  out_ref):
    T, Bt, _ = x_ref.shape
    H = w2f_ref.shape[0]
    lens = lens_ref[...]                                               # (Bt, 1) int32

    def cell(x_t, h_prev, w1_ref, w2_ref, b1_ref, b2_ref):
        # fused gates: g = [x_t, h_prev] @ [[Wih]; [Whh with n-column zeroed]] + b1
        xh = jnp.concatenate([x_t, h_prev], axis=-1)                   # (Bt, D+H)
        g = jnp.dot(xh, w1_ref[...],
                    preferred_element_type=jnp.float32) + b1_ref[...]  # (Bt, 3H)
        gh_n = jnp.dot(h_prev, w2_ref[...],
                       preferred_element_type=jnp.float32) + b2_ref[...]  # (Bt, H)
        r = jax.nn.sigmoid(g[:, 0:H])
        z = jax.nn.sigmoid(g[:, H:2 * H])
        c = jnp.tanh(g[:, 2 * H:3 * H] + r * gh_n)
        return (1.0 - z) * c + z * h_prev

    def step(t, carry):
        h_f, h_b = carry
        # forward direction: timestep t
        hf_new = cell(x_ref[t], h_f, w1f_ref, w2f_ref, b1f_ref, b2f_ref)
        valid_f = t < lens                                             # (Bt, 1) bool
        h_f = jnp.where(valid_f, hf_new, h_f)
        out_ref[t, :, 0:H] = jnp.where(valid_f, hf_new, 0.0)           # pad_packed fills 0
        # backward direction: timestep T-1-t (hidden stays 0 on trailing padding)
        tb = T - 1 - t
        hb_new = cell(x_ref[tb], h_b, w1b_ref, w2b_ref, b1b_ref, b2b_ref)
        valid_b = tb < lens
        h_b = jnp.where(valid_b, hb_new, h_b)
        out_ref[tb, :, H:2 * H] = jnp.where(valid_b, h_b, 0.0)
        return h_f, h_b

    h0 = jnp.zeros((Bt, H), jnp.float32)
    jax.lax.fori_loop(0, T, step, (h0, h0))


def _fuse_gru_dir(d, H):
    """Fuse (Wih, Whh) into one stacked matrix for the r/z gates + separate n path."""
    wih, whh, bih, bhh = d['wih'], d['whh'], d['bih'], d['bhh']
    whh_rz = whh.at[:, 2 * H:].set(0.0)
    w1 = jnp.concatenate([wih, whh_rz], axis=0)                        # (D+H, 3H)
    b1 = jnp.concatenate([bih[:, :2 * H] + bhh[:, :2 * H], bih[:, 2 * H:]], axis=-1)
    w2 = whh[:, 2 * H:]                                                # (H, H)
    b2 = bhh[:, 2 * H:]                                                # (1, H)
    return w1, w2, b1, b2


def bigru(x, lens, p, *, batch_tile=128):
    """x: (T, B, D) f32 time-major, lens: (B,) int32  ->  (T, B, 2H) f32 [fwd ++ bwd]."""
    T, B, D = x.shape
    H = p['f']['whh'].shape[0]
    w1f, w2f, b1f, b2f = _fuse_gru_dir(p['f'], H)
    w1b, w2b, b1b, b2b = _fuse_gru_dir(p['b'], H)
    lens2 = lens.reshape(B, 1).astype(jnp.int32)
    bt = B if B <= batch_tile else batch_tile

    def wfull(shape):
        return pl.BlockSpec(shape, lambda i, sh=shape: (0,) * len(sh))

    return pl.pallas_call(
        _bigru_kernel,
        out_shape=jax.ShapeDtypeStruct((T, B, 2 * H), jnp.float32),
        grid_spec=pltpu.PrefetchScalarGridSpec(
            num_scalar_prefetch=0,
            grid=(pl.cdiv(B, bt),),
            in_specs=[
                pl.BlockSpec((T, bt, D), lambda i: (0, i, 0)),   # x, passed once
                pl.BlockSpec((bt, 1), lambda i: (i, 0)),         # per-row lengths
                wfull(w1f.shape), wfull(w2f.shape), wfull(b1f.shape), wfull(b2f.shape),
                wfull(w1b.shape), wfull(w2b.shape), wfull(b1b.shape), wfull(b2b.shape),
            ],
            out_specs=pl.BlockSpec((T, bt, 2 * H), lambda i: (0, i, 0)),
        ),
        compiler_params=_compiler_params(),
    )(x, lens2, w1f, w2f, b1f, b2f, w1b, w2b, b1b, b2b)


# ---------------------------------------------------------------------------
# Attention (mean query over padded timesteps, masked softmax, weighted sum),
# optionally fused with the final Linear classifier.
# ---------------------------------------------------------------------------
def _make_attention_kernel(with_proj):
    def kernel(hid_ref, lens_ref, invt_ref, wq_ref, bq_ref, wk_ref, bk_ref, *rest):
        if with_proj:
            pw_ref, pb_ref, out_ref = rest
        else:
            (out_ref,) = rest
        T, Bt, H = hid_ref.shape
        lens = lens_ref[...]                                           # (Bt, 1) int32

        # query = mean_t(h_t @ Wq + bq); padded h_t are exactly 0, divisor = max(len)
        hsum = jax.lax.fori_loop(
            0, T, lambda t, acc: acc + hid_ref[t], jnp.zeros((Bt, H), jnp.float32))
        query = (jnp.dot(hsum, wq_ref[...], preferred_element_type=jnp.float32)
                 * invt_ref[...] + bq_ref[...])                        # (Bt, H)

        # streaming masked softmax over time + weighted sum of hidden states
        def att_step(t, carry):
            m, l, acc = carry
            h_t = hid_ref[t]                                           # (Bt, H)
            k_t = jnp.tanh(jnp.dot(h_t, wk_ref[...],
                                   preferred_element_type=jnp.float32) + bk_ref[...])
            s_t = jnp.sum(k_t * query, axis=-1, keepdims=True)         # (Bt, 1)
            s_t = s_t + jnp.where(t >= lens, -10000.0, 0.0)            # PyTorch-style mask
            m_new = jnp.maximum(m, s_t)
            alpha = jnp.exp(m - m_new)
            p = jnp.exp(s_t - m_new)
            return m_new, alpha * l + p, alpha * acc + p * h_t

        m0 = jnp.full((Bt, 1), -1e30, jnp.float32)
        l0 = jnp.zeros((Bt, 1), jnp.float32)
        a0 = jnp.zeros((Bt, H), jnp.float32)
        _, l, acc = jax.lax.fori_loop(0, T, att_step, (m0, l0, a0))
        ctx = acc / l                                                  # (Bt, H)

        if with_proj:
            out_ref[...] = (jnp.dot(ctx, pw_ref[...],
                                    preferred_element_type=jnp.float32) + pb_ref[...])
        else:
            out_ref[...] = ctx
    return kernel


def attention(hidden, lens, p, proj=None, *, batch_tile=128):
    """hidden: (T, B, H) f32, lens: (B,) -> (B, H), or (B, num_labels) if proj given."""
    T, B, H = hidden.shape
    lens2 = lens.reshape(B, 1).astype(jnp.int32)
    # hoisted out of the kernel; guarded against the all-empty-batch case
    inv_t = (1.0 / jnp.maximum(jnp.max(lens), 1).astype(jnp.float32)).reshape(1, 1)
    bt = B if B <= batch_tile else batch_tile
    with_proj = proj is not None
    d_out = proj[0].shape[1] if with_proj else H

    def wfull(shape):
        return pl.BlockSpec(shape, lambda i, sh=shape: (0,) * len(sh))

    in_specs = [
        pl.BlockSpec((T, bt, H), lambda i: (0, i, 0)),
        pl.BlockSpec((bt, 1), lambda i: (i, 0)),
        wfull((1, 1)),
        wfull(p['wq'].shape), wfull(p['bq'].shape),
        wfull(p['wk'].shape), wfull(p['bk'].shape),
    ]
    args = [hidden, lens2, inv_t, p['wq'], p['bq'], p['wk'], p['bk']]
    if with_proj:
        in_specs += [wfull(proj[0].shape), wfull(proj[1].shape)]
        args += [proj[0], proj[1]]

    return pl.pallas_call(
        _make_attention_kernel(with_proj),
        out_shape=jax.ShapeDtypeStruct((B, d_out), jnp.float32),
        grid_spec=pltpu.PrefetchScalarGridSpec(
            num_scalar_prefetch=0,
            grid=(pl.cdiv(B, bt),),
            in_specs=in_specs,
            out_specs=pl.BlockSpec((bt, d_out), lambda i: (i, 0)),
        ),
        compiler_params=_compiler_params(),
    )(*args)


# ---------------------------------------------------------------------------
# TextHAN forward
# ---------------------------------------------------------------------------
def text_han_forward(params, x, word_lens, labels=None):
    n, sl, wl = x.shape
    B = n * sl
    # Build the word-level input directly time-major by transposing the *small*
    # int32 index array before the embedding gather (avoids an HBM relayout of
    # the large activation tensor).
    x_t = x.reshape(B, wl).T                                           # (wl, B) int32
    word_x = params['embedding'][x_t].astype(jnp.float32)              # (wl, B, D) gather glue
    word_lens_flat = word_lens.reshape(B).astype(jnp.int32)

    # word-level BiGRU + attention (zero-length sentences yield an exact 0 vector,
    # matching the explicit zero-padding + restore-index path in the PyTorch code)
    word_out = bigru(word_x, word_lens_flat, params['word_gru'])       # (wl, B, 2H)
    sent_vec = attention(word_out, word_lens_flat, params['word_att'])  # (B, 2H)

    H2 = sent_vec.shape[-1]
    # tiny (n, sl, 2H) relayout; plain-JAX glue
    sent_x = jnp.transpose(sent_vec.reshape(n, sl, H2), (1, 0, 2))     # (sl, n, 2H)
    sent_lens = jnp.sum((word_lens > 0).astype(jnp.int32), axis=1)     # (n,)

    # sentence-level BiGRU + attention fused with the classifier
    sent_out = bigru(sent_x, sent_lens, params['sent_gru'])            # (sl, n, 4H)
    logits = attention(sent_out, sent_lens, params['sent_att'],
                       proj=(params['cls_w'], params['cls_b']))        # (n, num_labels)
    if labels is None:
        return logits
    # CrossEntropyLoss (mean reduction) — plain-JAX glue
    logp = jax.nn.log_softmax(logits, axis=-1)
    return -jnp.mean(jnp.take_along_axis(logp, labels[:, None], axis=-1))


# ---------------------------------------------------------------------------
# Deterministic synthetic parameter init (mirrors module __init__ shapes)
# ---------------------------------------------------------------------------
def init_params(key, vocab_size, emb_dim, hidden, num_labels):
    ks = jax.random.split(key, 8)

    def lin_w(k, fin, fout):
        return 0.1 * jax.random.normal(k, (fin, fout), jnp.float32)    # normal(0, 0.1)

    def gru_dir(k, din, h):
        kk = jax.random.split(k, 4)
        lim = 1.0 / (h ** 0.5)
        u = lambda kk_, sh: jax.random.uniform(kk_, sh, jnp.float32, -lim, lim)
        return dict(wih=u(kk[0], (din, 3 * h)), whh=u(kk[1], (h, 3 * h)),
                    bih=u(kk[2], (1, 3 * h)), bhh=u(kk[3], (1, 3 * h)))

    def gru(k, din, h):
        k1, k2 = jax.random.split(k)
        return dict(f=gru_dir(k1, din, h), b=gru_dir(k2, din, h))

    def att(k, h):
        k1, k2 = jax.random.split(k)
        return dict(wq=lin_w(k1, h, h), bq=jnp.zeros((1, h), jnp.float32),
                    wk=lin_w(k2, h, h), bk=jnp.zeros((1, h), jnp.float32))

    return dict(
        embedding=0.1 * jax.random.normal(ks[0], (vocab_size, emb_dim), jnp.float32),
        word_gru=gru(ks[1], emb_dim, hidden),
        word_att=att(ks[2], 2 * hidden),
        sent_gru=gru(ks[3], 2 * hidden, 2 * hidden),
        sent_att=att(ks[4], 4 * hidden),
        cls_w=lin_w(ks[5], 4 * hidden, num_labels),
        cls_b=jnp.zeros((1, num_labels), jnp.float32),
    )


if __name__ == "__main__":
    key = jax.random.PRNGKey(0)
    vocab_size, emb_dim, hidden, num_labels = 50, 16, 16, 4
    n, sl, wl = 2, 3, 8            # docs, sentences/doc, words/sentence

    kx, kp = jax.random.split(key)
    x = jax.random.randint(kx, (n, sl, wl), 0, vocab_size, dtype=jnp.int32)
    word_lens = jnp.array([[5, 0, 8],
                           [3, 2, 6]], dtype=jnp.int32)     # includes a zero-length sentence

    params = init_params(kp, vocab_size, emb_dim, hidden, num_labels)
    logits = text_han_forward(params, x, word_lens)
    logits = jax.block_until_ready(logits)

    assert logits.shape == (n, num_labels)
    assert bool(jnp.all(jnp.isfinite(logits)))
    print("KERNEL_OK")
</pallas_src>

<mosaic_0001>
module attributes {stable_mosaic.version = 11 : i64} {
  func.func @_bigru_kernel(%arg0: i32, %arg1: memref<8x6x16xf32, #tpu.memory_space<vmem>>, %arg2: memref<6x1xi32, #tpu.memory_space<vmem>>, %arg3: memref<32x48xf32, #tpu.memory_space<vmem>>, %arg4: memref<16x16xf32, #tpu.memory_space<vmem>>, %arg5: memref<1x48xf32, #tpu.memory_space<vmem>>, %arg6: memref<1x16xf32, #tpu.memory_space<vmem>>, %arg7: memref<32x48xf32, #tpu.memory_space<vmem>>, %arg8: memref<16x16xf32, #tpu.memory_space<vmem>>, %arg9: memref<1x48xf32, #tpu.memory_space<vmem>>, %arg10: memref<1x16xf32, #tpu.memory_space<vmem>>, %arg11: memref<8x6x32xf32, #tpu.memory_space<vmem>>) attributes {dimension_semantics = [#tpu.dimension_semantics<parallel>], iteration_bounds = array<i64: 1>, scalar_prefetch = 0 : i64, scratch_operands = 0 : i64, tpu.core_type = #tpu.core_type<tc>, window_params = [{transform_indices = @transform_0, window_bounds = array<i64: 8, 6, 16>}, {transform_indices = @transform_1, window_bounds = array<i64: 6, 1>}, {pipeline_mode = #tpu.pipeline_mode<synchronous>, transform_indices = @transform_2, window_bounds = array<i64: 32, 48>}, {pipeline_mode = #tpu.pipeline_mode<synchronous>, transform_indices = @transform_3, window_bounds = array<i64: 16, 16>}, {pipeline_mode = #tpu.pipeline_mode<synchronous>, transform_indices = @transform_4, window_bounds = array<i64: 1, 48>}, {pipeline_mode = #tpu.pipeline_mode<synchronous>, transform_indices = @transform_5, window_bounds = array<i64: 1, 16>}, {pipeline_mode = #tpu.pipeline_mode<synchronous>, transform_indices = @transform_6, window_bounds = array<i64: 32, 48>}, {pipeline_mode = #tpu.pipeline_mode<synchronous>, transform_indices = @transform_7, window_bounds = array<i64: 16, 16>}, {pipeline_mode = #tpu.pipeline_mode<synchronous>, transform_indices = @transform_8, window_bounds = array<i64: 1, 48>}, {pipeline_mode = #tpu.pipeline_mode<synchronous>, transform_indices = @transform_9, window_bounds = array<i64: 1, 16>}, {transform_indices = @transform_10, window_bounds = array<i64: 8, 6, 32>}]} {
    %c0 = arith.constant 0 : index
    %c0_0 = arith.constant 0 : index
    %0 = vector.load %arg2[%c0, %c0_0] : memref<6x1xi32, #tpu.memory_space<vmem>>, vector<6x1xi32>
    %cst = arith.constant 0.000000e+00 : f32
    %1 = vector.broadcast %cst : f32 to vector<6x16xf32>
    %c0_i32 = arith.constant 0 : i32
    %c8_i32 = arith.constant 8 : i32
    %2 = arith.addi %c0_i32, %c8_i32 : i32
    %c1_i32 = arith.constant 1 : i32
    %3:2 = scf.for %arg12 = %c0_i32 to %2 step %c1_i32 iter_args(%arg13 = %1, %arg14 = %1) -> (vector<6x16xf32>, vector<6x16xf32>)  : i32 {
      %4 = arith.index_cast %arg12 : i32 to index
      %c0_2 = arith.constant 0 : index
      %c0_3 = arith.constant 0 : index
      %5 = vector.load %arg1[%4, %c0_2, %c0_3] : memref<8x6x16xf32, #tpu.memory_space<vmem>>, vector<1x6x16xf32>
      %6 = vector.shape_cast %5 : vector<1x6x16xf32> to vector<6x16xf32>
      %7 = tpu.concatenate %6, %arg13 in 1 : vector<6x16xf32>, vector<6x16xf32> -> vector<6x32xf32>
      %c0_4 = arith.constant 0 : index
      %c0_5 = arith.constant 0 : index
      %8 = vector.load %arg3[%c0_4, %c0_5] : memref<32x48xf32, #tpu.memory_space<vmem>>, vector<32x48xf32>
      %cst_6 = arith.constant dense<0.000000e+00> : vector<6x48xf32>
      %9 = tpu.matmul %7, %8, %cst_6 {dimension_numbers = #tpu.dot_dimension_numbers<[1], [0], [0], [1], [0, 0, 1, 1], [], []>} : vector<6x32xf32>, vector<32x48xf32>, vector<6x48xf32> -> vector<6x48xf32>
      %c0_7 = arith.constant 0 : index
      %c0_8 = arith.constant 0 : index
      %10 = vector.load %arg5[%c0_7, %c0_8] : memref<1x48xf32, #tpu.memory_space<vmem>>, vector<1x48xf32>
      %11 = vector.broadcast %10 : vector<1x48xf32> to vector<6x48xf32>
      %12 = arith.addf %9, %11 : vector<6x48xf32>
      %c0_9 = arith.constant 0 : index
      %c0_10 = arith.constant 0 : index
      %13 = vector.load %arg4[%c0_9, %c0_10] : memref<16x16xf32, #tpu.memory_space<vmem>>, vector<16x16xf32>
      %cst_11 = arith.constant dense<0.000000e+00> : vector<6x16xf32>
      %14 = tpu.matmul %arg13, %13, %cst_11 {dimension_numbers = #tpu.dot_dimension_numbers<[1], [0], [0], [1], [0, 0, 1, 1], [], []>} : vector<6x16xf32>, vector<16x16xf32>, vector<6x16xf32> -> vector<6x16xf32>
      %c0_12 = arith.constant 0 : index
      %c0_13 = arith.constant 0 : index
      %15 = vector.load %arg6[%c0_12, %c0_13] : memref<1x16xf32, #tpu.memory_space<vmem>>, vector<1x16xf32>
      %16 = vector.broadcast %15 : vector<1x16xf32> to vector<6x16xf32>
      %17 = arith.addf %14, %16 : vector<6x16xf32>
      %18 = vector.extract_strided_slice %12 {offsets = [0, 0], sizes = [6, 16], strides = [1, 1]} : vector<6x48xf32> to vector<6x16xf32>
      %19 = arith.negf %18 : vector<6x16xf32>
      %20 = math.exp %19 : vector<6x16xf32>
      %cst_14 = arith.constant 1.000000e+00 : f32
      %21 = vector.broadcast %cst_14 : f32 to vector<6x16xf32>
      %22 = arith.addf %21, %20 : vector<6x16xf32>
      %23 = arith.divf %21, %22 : vector<6x16xf32>
      %24 = vector.extract_strided_slice %12 {offsets = [0, 16], sizes = [6, 16], strides = [1, 1]} : vector<6x48xf32> to vector<6x16xf32>
      %25 = arith.negf %24 : vector<6x16xf32>
      %26 = math.exp %25 : vector<6x16xf32>
      %cst_15 = arith.constant 1.000000e+00 : f32
      %27 = vector.broadcast %cst_15 : f32 to vector<6x16xf32>
      %28 = arith.addf %27, %26 : vector<6x16xf32>
      %29 = arith.divf %27, %28 : vector<6x16xf32>
      %30 = vector.extract_strided_slice %12 {offsets = [0, 32], sizes = [6, 16], strides = [1, 1]} : vector<6x48xf32> to vector<6x16xf32>
      %31 = arith.mulf %23, %17 : vector<6x16xf32>
      %32 = arith.addf %30, %31 : vector<6x16xf32>
      %33 = math.tanh %32 : vector<6x16xf32>
      %cst_16 = arith.constant 1.000000e+00 : f32
      %34 = vector.broadcast %cst_16 : f32 to vector<6x16xf32>
      %35 = arith.subf %34, %29 : vector<6x16xf32>
      %36 = arith.mulf %35, %33 : vector<6x16xf32>
      %37 = arith.mulf %29, %arg13 : vector<6x16xf32>
      %38 = arith.addf %36, %37 : vector<6x16xf32>
      %39 = vector.broadcast %arg12 : i32 to vector<6x1xi32>
      %40 = arith.cmpi slt, %39, %0 : vector<6x1xi32>
      %41 = vector.shape_cast %40 : vector<6x1xi1> to vector<6x1xi1>
      %42 = vector.broadcast %41 : vector<6x1xi1> to vector<6x16xi1>
      %43 = arith.select %42, %38, %arg13 : vector<6x16xi1>, vector<6x16xf32>
      %cst_17 = arith.constant 0.000000e+00 : f32
      %44 = vector.shape_cast %40 : vector<6x1xi1> to vector<6x1xi1>
      %45 = vector.broadcast %44 : vector<6x1xi1> to vector<6x16xi1>
      %46 = vector.broadcast %cst_17 : f32 to vector<6x16xf32>
      %47 = arith.select %45, %38, %46 : vector<6x16xi1>, vector<6x16xf32>
      %48 = arith.index_cast %arg12 : i32 to index
      %c0_18 = arith.constant 0 : index
      %c0_19 = arith.constant 0 : index
      %49 = vector.load %arg11[%48, %c0_18, %c0_19] : memref<8x6x32xf32, #tpu.memory_space<vmem>>, vector<1x6x16xf32>
      %50 = vector.shape_cast %49 : vector<1x6x16xf32> to vector<6x16xf32>
      %51 = vector.shape_cast %47 : vector<6x16xf32> to vector<1x6x16xf32>
      tpu.vector_store %arg11[%48, %c0_18, %c0_19], %51 {strides = array<i32>} : memref<8x6x32xf32, #tpu.memory_space<vmem>>, vector<1x6x16xf32>,
      %c7_i32 = arith.constant 7 : i32
      %52 = arith.subi %c7_i32, %arg12 : i32
      %53 = arith.index_cast %52 : i32 to index
      %c0_20 = arith.constant 0 : index
      %c0_21 = arith.constant 0 : index
      %54 = vector.load %arg1[%53, %c0_20, %c0_21] : memref<8x6x16xf32, #tpu.memory_space<vmem>>, vector<1x6x16xf32>
      %55 = vector.shape_cast %54 : vector<1x6x16xf32> to vector<6x16xf32>
      %56 = tpu.concatenate %55, %arg14 in 1 : vector<6x16xf32>, vector<6x16xf32> -> vector<6x32xf32>
      %c0_22 = arith.constant 0 : index
      %c0_23 = arith.constant 0 : index
      %57 = vector.load %arg7[%c0_22, %c0_23] : memref<32x48xf32, #tpu.memory_space<vmem>>, vector<32x48xf32>
      %cst_24 = arith.constant dense<0.000000e+00> : vector<6x48xf32>
      %58 = tpu.matmul %56, %57, %cst_24 {dimension_numbers = #tpu.dot_dimension_numbers<[1], [0], [0], [1], [0, 0, 1, 1], [], []>} : vector<6x32xf32>, vector<32x48xf32>, vector<6x48xf32> -> vector<6x48xf32>
      %c0_25 = arith.constant 0 : index
      %c0_26 = arith.constant 0 : index
      %59 = vector.load %arg9[%c0_25, %c0_26] : memref<1x48xf32, #tpu.memory_space<vmem>>, vector<1x48xf32>
      %60 = vector.broadcast %59 : vector<1x48xf32> to vector<6x48xf32>
      %61 = arith.addf %58, %60 : vector<6x48xf32>
      %c0_27 = arith.constant 0 : index
      %c0_28 = arith.constant 0 : index
      %62 = vector.load %arg8[%c0_27, %c0_28] : memref<16x16xf32, #tpu.memory_space<vmem>>, vector<16x16xf32>
      %cst_29 = arith.constant dense<0.000000e+00> : vector<6x16xf32>
      %63 = tpu.matmul %arg14, %62, %cst_29 {dimension_numbers = #tpu.dot_dimension_numbers<[1], [0], [0], [1], [0, 0, 1, 1], [], []>} : vector<6x16xf32>, vector<16x16xf32>, vector<6x16xf32> -> vector<6x16xf32>
      %c0_30 = arith.constant 0 : index
      %c0_31 = arith.constant 0 : index
      %64 = vector.load %arg10[%c0_30, %c0_31] : memref<1x16xf32, #tpu.memory_space<vmem>>, vector<1x16xf32>
      %65 = vector.broadcast %64 : vector<1x16xf32> to vector<6x16xf32>
      %66 = arith.addf %63, %65 : vector<6x16xf32>
      %67 = vector.extract_strided_slice %61 {offsets = [0, 0], sizes = [6, 16], strides = [1, 1]} : vector<6x48xf32> to vector<6x16xf32>
      %68 = arith.negf %67 : vector<6x16xf32>
      %69 = math.exp %68 : vector<6x16xf32>
      %cst_32 = arith.constant 1.000000e+00 : f32
      %70 = vector.broadcast %cst_32 : f32 to vector<6x16xf32>
      %71 = arith.addf %70, %69 : vector<6x16xf32>
      %72 = arith.divf %70, %71 : vector<6x16xf32>
      %73 = vector.extract_strided_slice %61 {offsets = [0, 16], sizes = [6, 16], strides = [1, 1]} : vector<6x48xf32> to vector<6x16xf32>
      %74 = arith.negf %73 : vector<6x16xf32>
      %75 = math.exp %74 : vector<6x16xf32>
      %cst_33 = arith.constant 1.000000e+00 : f32
      %76 = vector.broadcast %cst_33 : f32 to vector<6x16xf32>
      %77 = arith.addf %76, %75 : vector<6x16xf32>
      %78 = arith.divf %76, %77 : vector<6x16xf32>
      %79 = vector.extract_strided_slice %61 {offsets = [0, 32], sizes = [6, 16], strides = [1, 1]} : vector<6x48xf32> to vector<6x16xf32>
      %80 = arith.mulf %72, %66 : vector<6x16xf32>
      %81 = arith.addf %79, %80 : vector<6x16xf32>
      %82 = math.tanh %81 : vector<6x16xf32>
      %cst_34 = arith.constant 1.000000e+00 : f32
      %83 = vector.broadcast %cst_34 : f32 to vector<6x16xf32>
      %84 = arith.subf %83, %78 : vector<6x16xf32>
      %85 = arith.mulf %84, %82 : vector<6x16xf32>
      %86 = arith.mulf %78, %arg14 : vector<6x16xf32>
      %87 = arith.addf %85, %86 : vector<6x16xf32>
      %88 = vector.broadcast %52 : i32 to vector<6x1xi32>
      %89 = arith.cmpi slt, %88, %0 : vector<6x1xi32>
      %90 = vector.shape_cast %89 : vector<6x1xi1> to vector<6x1xi1>
      %91 = vector.broadcast %90 : vector<6x1xi1> to vector<6x16xi1>
      %92 = arith.select %91, %87, %arg14 : vector<6x16xi1>, vector<6x16xf32>
      %cst_35 = arith.constant 0.000000e+00 : f32
      %93 = vector.shape_cast %89 : vector<6x1xi1> to vector<6x1xi1>
      %94 = vector.broadcast %93 : vector<6x1xi1> to vector<6x16xi1>
      %95 = vector.broadcast %cst_35 : f32 to vector<6x16xf32>
      %96 = arith.select %94, %92, %95 : vector<6x16xi1>, vector<6x16xf32>
      %97 = arith.index_cast %52 : i32 to index
      %c0_36 = arith.constant 0 : index
      %c16 = arith.constant 16 : index
      %98 = vector.load %arg11[%97, %c0_36, %c16] : memref<8x6x32xf32, #tpu.memory_space<vmem>>, vector<1x6x16xf32>
      %99 = vector.shape_cast %98 : vector<1x6x16xf32> to vector<6x16xf32>
      %100 = vector.shape_cast %96 : vector<6x16xf32> to vector<1x6x16xf32>
      tpu.vector_store %arg11[%97, %c0_36, %c16], %100 {strides = array<i32>} : memref<8x6x32xf32, #tpu.memory_space<vmem>>, vector<1x6x16xf32>,
      scf.yield %43, %92 : vector<6x16xf32>, vector<6x16xf32>
    }
    %c8_i32_1 = arith.constant 8 : i32
    return
  }
  func.func @transform_0(%arg0: i32) -> (i32, i32, i32) {
    %c0_i32 = arith.constant 0 : i32
    %c0_i32_0 = arith.constant 0 : i32
    %c0_i32_1 = arith.constant 0 : i32
    return %c0_i32, %arg0, %c0_i32_0 : i32, i32, i32
  }
  func.func @transform_1(%arg0: i32) -> (i32, i32) {
    %c0_i32 = arith.constant 0 : i32
    %c0_i32_0 = arith.constant 0 : i32
    return %arg0, %c0_i32 : i32, i32
  }
  func.func @transform_2(%arg0: i32) -> (i32, i32) {
    %c0_i32 = arith.constant 0 : i32
    %c0_i32_0 = arith.constant 0 : i32
    %c0_i32_1 = arith.constant 0 : i32
    return %c0_i32, %c0_i32_0 : i32, i32
  }
  func.func @transform_3(%arg0: i32) -> (i32, i32) {
    %c0_i32 = arith.constant 0 : i32
    %c0_i32_0 = arith.constant 0 : i32
    %c0_i32_1 = arith.constant 0 : i32
    return %c0_i32, %c0_i32_0 : i32, i32
  }
  func.func @transform_4(%arg0: i32) -> (i32, i32) {
    %c0_i32 = arith.constant 0 : i32
    %c0_i32_0 = arith.constant 0 : i32
    %c0_i32_1 = arith.constant 0 : i32
    return %c0_i32, %c0_i32_0 : i32, i32
  }
  func.func @transform_5(%arg0: i32) -> (i32, i32) {
    %c0_i32 = arith.constant 0 : i32
    %c0_i32_0 = arith.constant 0 : i32
    %c0_i32_1 = arith.constant 0 : i32
    return %c0_i32, %c0_i32_0 : i32, i32
  }
  func.func @transform_6(%arg0: i32) -> (i32, i32) {
    %c0_i32 = arith.constant 0 : i32
    %c0_i32_0 = arith.constant 0 : i32
    %c0_i32_1 = arith.constant 0 : i32
    return %c0_i32, %c0_i32_0 : i32, i32
  }
  func.func @transform_7(%arg0: i32) -> (i32, i32) {
    %c0_i32 = arith.constant 0 : i32
    %c0_i32_0 = arith.constant 0 : i32
    %c0_i32_1 = arith.constant 0 : i32
    return %c0_i32, %c0_i32_0 : i32, i32
  }
  func.func @transform_8(%arg0: i32) -> (i32, i32) {
    %c0_i32 = arith.constant 0 : i32
    %c0_i32_0 = arith.constant 0 : i32
    %c0_i32_1 = arith.constant 0 : i32
    return %c0_i32, %c0_i32_0 : i32, i32
  }
  func.func @transform_9(%arg0: i32) -> (i32, i32) {
    %c0_i32 = arith.constant 0 : i32
    %c0_i32_0 = arith.constant 0 : i32
    %c0_i32_1 = arith.constant 0 : i32
    return %c0_i32, %c0_i32_0 : i32, i32
  }
  func.func @transform_10(%arg0: i32) -> (i32, i32, i32) {
    %c0_i32 = arith.constant 0 : i32
    %c0_i32_0 = arith.constant 0 : i32
    %c0_i32_1 = arith.constant 0 : i32
    return %c0_i32, %arg0, %c0_i32_0 : i32, i32, i32
  }
}

</mosaic_0001>

<bundles_post_ra>
// kernel: tpu_custom_call.1
= control target key start
LH: loop header
LB: loop body
LE: loop exit
PB: predicated region body
PF: predicated region fallthrough
CT: control target
= control target key end

     0   :  { %v700_v1 = vmov 0.0   ;;  %v702_v2 = vmov 0.0   ;;  %s704_s15 = smov 0   ;;  %s822_s0 = inlined_call_operand.vmem [shape: f32[8,6,16], index: 0, kind: input, shape index: {}]   ;;  %s823_s1 = inlined_call_operand.vmem [shape: s32[6,1], index: 1, kind: input, shape index: {}]   ;;  %s824_s2 = inlined_call_operand.vmem [shape: f32[32,48], index: 2, kind: input, shape index: {}]   ;;  %s825_s3 = inlined_call_operand.vmem [shape: f32[16,16], index: 3, kind: input, shape index: {}]   ;;  %s826_s4 = inlined_call_operand.vmem [shape: f32[1,48], index: 4, kind: input, shape index: {}]   ;;  %s827_s5 = inlined_call_operand.vmem [shape: f32[1,16], index: 5, kind: input, shape index: {}]   ;;  %s828_s6 = inlined_call_operand.vmem [shape: f32[32,48], index: 6, kind: input, shape index: {}]   ;;  %s829_s7 = inlined_call_operand.vmem [shape: f32[16,16], index: 7, kind: input, shape index: {}]   ;;  %s830_s8 = inlined_call_operand.vmem [shape: f32[1,48], index: 8, kind: input, shape index: {}]   ;;  %s831_s9 = inlined_call_operand.vmem [shape: f32[1,16], index: 9, kind: input, shape index: {}]   ;;  %s832_s10 = inlined_call_operand.vmem [shape: f32[8,6,32], index: 10, kind: output, shape index: {}]  }
   0x1   :  { %v698_v0 = vld [vmem:[%s823_s1] sm:$0x3f] }
   0x2 LB: > { %v49_v3 = vld [vmem:[%s824_s2] sm:$0xff]  ;;  %v50_v4 = vld [vmem:[%s824_s2 + $0x8] sm:$0xff]  ;;  %v51_v5 = vld [vmem:[%s824_s2 + $0x10] sm:$0xff]  ;;  %v634_v6 = vmov 0.0|0.0   ;;  %s635_s27 = smov 112   ;;  %vm636_vm0 = vmmov 0   ;;  %v239_v36 = vstv %s632_s15  ;;  %s632_s15 = sphi %s704_s15, %s41_s15   ;;  %v628_v2 = vphi %v702_v2, %v246_v2   ;;  %v624_v1 = vphi %v700_v1, %v456_v1  }
   0x3   : > { %548 = vmatprep.subr.bf16.mxu0 %v634_v6  ;;  %v549_v7 = vpack.c.bf16 %v50_v4, %v49_v3  ;;  %v52_v8 = vld [vmem:[%s824_s2 + $0x18] sm:$0xff]  ;;  %554 = vmatprep.subr.bf16.mxu1 %v634_v6  ;;  %v134_v9 = vld [vmem:[%s825_s3] sm:$0xff]  ;;  %v135_v10 = vld [vmem:[%s825_s3 + $0x8] sm:$0xff]  ;;  %v637_v11 = vmov 0.0   ;;  %s484_s28 = sshll.u32 %s632_s15, 3  ;;  %vm47_vm1 = vcmask 130048   ;;  %vm240_vm3 = vcmp.lt.s32.totalorder %v239_v36, %v698_v0 }
   0x4   : > { %144 = vrot.lane.b32.xlu0 %v628_v2, %s635_s27  ;;  %520 = vmatprep.mubr.msk.f32.mxu0 %vm636_vm0, %v637_v11  ;;  %v555_v12 = vpack.c.bf16 %v135_v10, %v134_v9  ;;  %v552_v13 = vpack.c.bf16 %v52_v8, %v51_v5  ;;  %s45_s11 = scalar_lea.vmem %s822_s0, %s484_s28  ;;  %v344_v15 = vld [vmem:[%s829_s7] sm:$0xff]  ;;  %v345_v16 = vld [vmem:[%s829_s7 + $0x8] sm:$0xff]  ;;  %vm60_vm2 = vcmask 261120   ;;  %s255_s1 = ssub.s32 7, %s632_s15  ;;  %v262_v22 = vld [vmem:[%s828_s6 + $0x10] sm:$0xff]  ;;  %v638_v37 = vmov 0  }
   0x5   : > { %550 = vmatpush3.bf16.msra.mxu0 %v549_v7  ;;  %527 = vmatprep.mubr.msk.f32.mxu1 %vm636_vm0, %v637_v11  ;;  %v46_v14 = vld [vmem:[%s45_s11] sm:$0x3f]  ;;  %v564_v18 = vpack.c.bf16 %v345_v16, %v344_v15  ;;  %v261_v20 = vld [vmem:[%s828_s6 + $0x8] sm:$0xff]  ;;  %s764_s21 = sshll.u32 %s255_s1, 3  ;;  %v263_v23 = vld [vmem:[%s828_s6 + $0x18] sm:$0xff]  ;;  %v241_v38 = vsel %vm240_vm3, 1, %v638_v37  ;;  %v449_v60 = vstv %s255_s1  ;;  %s252_s23 = scalar_lea.vmem %s832_s10, %s484_s28 }
   0x6   : > { %551 = vmatprep.subr.bf16.mxu0 %v634_v6  ;;  %556 = vmatpush3.bf16.msra.mxu1 %v555_v12  ;;  %v48_v17 = vsel %vm47_vm1, %v46_v14, %v628_v2  ;;  %v260_v19 = vld [vmem:[%s828_s6] sm:$0xff]  ;;  %s257_s30 = scalar_lea.vmem %s822_s0, %s764_s21  ;;  %v561_v25 = vpack.c.bf16 %v263_v23, %v262_v22  ;;  %s639_s16 = smov 32   ;;  %vm450_vm4 = vcmp.lt.s32.totalorder %v449_v60, %v698_v0  ;;  %vm253_vm7 = vcmask 128000  }
   0x7   : > { %557 = vmatprep.subr.bf16.mxu1 %v634_v6  ;;  %v558_v21 = vpack.c.bf16 %v261_v20, %v260_v19  ;;  %v258_v26 = vld [vmem:[%s257_s30] sm:$0x3f]  ;;  %596 = vset.pattern.permute.xlu0 %v638_v37  ;;  %v451_v62 = vsel %vm450_vm4, 1, %v638_v37  ;;  %vm459_vm8 = vcmask 259200   ;;  %s41_s15 = sadd.s32 1, %s632_s15  }
   0x8   : > { %354 = vrot.lane.b32.xlu0 %v624_v1, %s635_s27  ;;  %v259_v28 = vsel %vm47_vm1, %v258_v26, %v624_v1  ;;  %v485_v31 = vld [vmem:[%s826_s4] ss:$0 sm:$0xff]  ;;  %597 = vset.pattern.permute.xlu1 %v638_v37  ;;  %p38_p0 = scmp.ge.s32.totalorder %s41_s15, 8  }
   0x9   : > { %553 = vmatpush3.bf16.msra.mxu0 %v552_v13  ;;  %v487_v39 = vld [vmem:[%s827_s5] ss:$0 sm:$0xff] }
   0xa   : > { %563 = vmatprep.subr.bf16.mxu0 %v634_v6  ;;  %v491_v47 = vld [vmem:[%s830_s8] ss:$0 sm:$0xff] }
   0xb   : > { %v493_v54 = vld [vmem:[%s831_s9] ss:$0 sm:$0xff] }
   0xc   : > { %521 = vmatmul.mubr.msk.f32.vlgmr.msra.gmra.mrb[0].mxu0 %vm60_vm2, %v48_v17  ;;  %243 = vperm.xlu0 %596, %v241_v38  }
   0xd   : > { %565 = vmatpush3.bf16.msra.mxu0 %v564_v18  ;;  %545 = vmatprep.mubr.msk.f32.mxu0 %vm636_vm0, %v637_v11 }
  0x76   : > { %v145_v24 = vpop.permute.xlu0 %144 }
  0x77   : > { %528 = vmatmul.mubr.msk.f32.vlgmr.msra.gmra.mrb[0].mxu1 %vm47_vm1, %v145_v24 }
  0x78   : > { %559 = vmatpush3.bf16.msra.mxu1 %v558_v21  ;;  %538 = vmatprep.mubr.msk.f32.mxu1 %vm636_vm0, %v637_v11 }
  0x79   : > { %560 = vmatprep.subr.bf16.mxu1 %v634_v6 }
  0x7a   : > { %v355_v27 = vpop.permute.xlu0 %354 }
  0x7b   : > { %546 = vmatmul.mubr.msk.f32.vlgmr.msra.gmra.mrb[2].mxu0 %vm47_vm1, %v355_v27 }
  0x7c   : > { %562 = vmatpush3.bf16.msra.mxu1 %v561_v25 }
  0x7f   : > { %539 = vmatmul.mubr.msk.f32.vlgmr.msra.gmra.mrb[2].mxu1 %vm60_vm2, %v259_v28 }
  0x8b   : > { %v244_v6 = vpop.permute.xlu0 %243 }
  0x8c   : > { %vm245_vm5 = vcmp.eq.s32.totalorder %v244_v6, 1 }
  0xdf   : > { %v130_v29 = vpop.f32.mrb[0].mxu0 }
  0xe0   : > { %v522_v30 = vpop.f32.mrb[1].mxu0  ;;  %v131_v32 = vadd.f32 %v485_v31, %v130_v29 }
  0xe2   : > { %v489_v33 = vmul.f32 -1.442695, %v131_v32 }
  0xe4   : > { %598 = vpow2.f32 %v489_v33 }
  0xee   : > { %v599_v34 = vpop.eup %598 }
  0xef   : > { %v221_v35 = vadd.f32 1.0, %v599_v34 }
  0xf1   : > { %600 = vrcp.f32 %v221_v35 }
  0xfb   : > { %v601_v40 = vpop.eup %600 }
  0xfc   : > { %v231_v5 = vsub.f32 1.0, %v601_v40  ;;  %v237_v8 = vmul.f32 %v628_v2, %v601_v40 }
 0x14a   : > { %v214_v41 = vpop.f32.mrb[0].mxu1 }
 0x14b   : > { %v215_v42 = vadd.f32 %v487_v39, %v214_v41  ;;  %v529_v43 = vpop.f32.mrb[1].mxu1 }
 0x14d   : > { %v224_v44 = vmul.f32 %v601_v40, %v215_v42 }
 0x14e   : > { %v424_v45 = vpop.f32.mrb[2].mxu0 }
 0x14f   : > { %226 = vrot.lane.b32.xlu1 %v224_v44, %s639_s16  ;;  %v547_v46 = vpop.f32.mrb[3].mxu0  ;;  %v425_v55 = vadd.f32 %v493_v54, %v424_v45 }
 0x152   : > { %v340_v48 = vpop.f32.mrb[2].mxu1 }
 0x153   : > { %v341_v49 = vadd.f32 %v491_v47, %v340_v48  ;;  %v540_v50 = vpop.f32.mrb[3].mxu1 }
 0x155   : > { %v495_v51 = vmul.f32 -1.442695, %v341_v49 }
 0x157   : > { %602 = vpow2.f32 %v495_v51 }
 0x161   : > { %v603_v52 = vpop.eup %602 }
 0x162   : > { %v431_v53 = vadd.f32 1.0, %v603_v52 }
 0x164   : > { %604 = vrcp.f32 %v431_v53 }
 0x16e   : > { %v605_v56 = vpop.eup %604 }
 0x16f   : > { %v434_v57 = vmul.f32 %v605_v56, %v425_v55  ;;  %v441_v12 = vsub.f32 1.0, %v605_v56  ;;  %v447_v15 = vmul.f32 %v624_v1, %v605_v56 }
 0x171   : > { %436 = vrot.lane.b32.xlu1 %v434_v57, %s639_s16 }
 0x1c1   : > { %v227_v58 = vpop.permute.xlu1 %226 }
 0x1c2   : > { %v229_v59 = vadd.f32 %v227_v58, %v131_v32 }
 0x1c4   : > { %606 = vtanh.f32 %v229_v59 }
 0x1ce   : > { %v607_v61 = vpop.eup %606 }
 0x1cf   : > { %233 = vrot.lane.b32.xlu1 %v607_v61, %s635_s27 }
 0x1d3   : > { %453 = vperm.xlu1 %597, %v451_v62  }
 0x1e3   : > { %v437_v63 = vpop.permute.xlu1 %436 }
 0x1e4   : > { %v439_v3 = vadd.f32 %v437_v63, %v341_v49 }
 0x1e6   : > { %608 = vtanh.f32 %v439_v3 }
 0x1f0   : > { %v609_v4 = vpop.eup %608 }
 0x1f1   : > { %443 = vrot.lane.b32.xlu0 %v609_v4, %s635_s27 }
 0x241   : > { %v234_v7 = vpop.permute.xlu1 %233 }
 0x242   : > { %v236_v9 = vmul.f32 %v234_v7, %v231_v5 }
 0x244   : > { %v238_v10 = vadd.f32 %v237_v8, %v236_v9 }
 0x246   : > { %v246_v2 = vsel %vm245_vm5, %v238_v10, %v628_v2   ;;  %v247_v11 = vsel %vm245_vm5, %v238_v10, 0.0 }
 0x247   : > { %249 = vrot.lane.b32.xlu1 %v247_v11, %s635_s27  ;;  %s458_s27 = scalar_lea.vmem %s832_s10, %s764_s21 }
 0x252   : > { %v454_v13 = vpop.permute.xlu1 %453 }
 0x253   : > { %vm455_vm6 = vcmp.eq.s32.totalorder %v454_v13, 1 }
 0x263   : > { %v444_v14 = vpop.permute.xlu0 %443 }
 0x264   : > { %v446_v16 = vmul.f32 %v444_v14, %v441_v12 }
 0x266   : > { %v448_v17 = vadd.f32 %v447_v15, %v446_v16 }
 0x268   : > { %v456_v1 = vsel %vm455_vm6, %v448_v17, %v624_v1   ;;  %v457_v19 = vsel %vm455_vm6, %v448_v17, 0.0 }
 0x2b5   :  { %40 = sbr.rel (!%p38_p0) target bundleno = 2 (0x2), region = 71 }
 0x2b9   : > { %v250_v18 = vpop.permute.xlu1 %249 }
 0x2ba   : > { %254 = vst.msk [vmem:[%s252_s23] sm:$0x3f] %vm253_vm7, %v250_v18 }
 0x2bb   : > { %460 = vst.msk [vmem:[%s458_s27] sm:$0x3f] %vm459_vm8, %v457_v19 }

</bundles_post_ra>
